<compile_context>
chip_gen: v5e
topology: v5e:2x2
jax: 0.10.0
libtpu: 0.0.40
codegen_flags: <defaults>
</compile_context>

<pallas_src>
import jax
import jax.numpy as jnp
from jax.experimental import pallas as pl
from jax.experimental.pallas import tpu as pltpu


def _round_up(x, m):
    return ((x + m - 1) // m) * m


def _choose_tb(b_pad, block_b):
    """Largest multiple of 128 that divides b_pad, is <= block_b, and (when the
    padded batch allows it) leaves >= 2 grid steps so both v7x TensorCores get
    work under dimension_semantics=('parallel',)."""
    cap = min(block_b, b_pad if b_pad < 256 else b_pad // 2)
    tb = 128
    for t in range(128, cap + 1, 128):
        if b_pad % t == 0:
            tb = t
    return tb


def _qmlp_kernel(xT_ref, w1T_ref, b1_ref, w2T_ref, b2_ref, w3_ref, b3_ref, o_ref):
    """One batch tile (on lanes) of Q(s,a): Linear+ReLU -> Linear+ReLU -> Linear(1)."""
    xT = xT_ref[...]                                           # (D_in, TB)

    # Layer 1: fused K = obs_dim + act_dim contraction; MXU N dim = TB (lane-dense).
    h1 = jnp.dot(w1T_ref[...], xT, preferred_element_type=jnp.float32) + b1_ref[...]
    h1 = jnp.maximum(h1, 0.0)                                  # (H1, TB)

    # Layer 2.
    h2 = jnp.dot(w2T_ref[...], h1, preferred_element_type=jnp.float32) + b2_ref[...]
    h2 = jnp.maximum(h2, 0.0)                                  # (H2, TB)

    # Layer 3 (output width 1): VPU multiply + sublane reduce.  In this
    # orientation the (1, TB) result is already lane-dense -> unmasked stores.
    q = jnp.sum(h2 * w3_ref[...], axis=0, keepdims=True) + b3_ref[0]
    o_ref[...] = q.astype(o_ref.dtype)


def mlp_q_function(obs, act, params, *, block_b=4096):
    """Pallas MLPQFunction.forward: obs (B, obs_dim), act (B, act_dim) -> (B,) f32."""
    w1, b1, w2, b2, w3, b3 = params
    B, obs_dim = obs.shape
    d_in = obs_dim + act.shape[1]

    # Pre-transpose the (tiny) weights once; biases become broadcast columns.
    w1T = w1.T                                  # (H1, D_in)
    w2T = w2.T                                  # (H2, H1)
    b1T = b1.reshape(-1, 1)                     # (H1, 1)  broadcast over lanes
    b2T = b2.reshape(-1, 1)                     # (H2, 1)
    w3c = w3.reshape(-1, 1)                     # (H2, 1)  column for sublane reduce
    b3s = b3.reshape(-1).astype(jnp.float32)    # (1,) f32 scalar -> SMEM (32-bit)

    assert block_b % 128 == 0 and block_b >= 128
    b_pad = _round_up(B, 128)                   # pad only to 128, not to tb
    tb = _choose_tb(b_pad, block_b)

    # Concat + pad + transpose fuse into one wrapper-side XLA op; same HBM
    # bytes as separate transposed copies of obs/act, so the in-kernel split
    # of W1 is no longer needed.
    x = jnp.concatenate([obs, act], axis=-1)    # (B, D_in)
    if b_pad != B:
        x = jnp.pad(x, ((0, b_pad - B), (0, 0)))
    xT = x.T                                    # (D_in, b_pad), batch on lanes

    def resident(shape):                        # constant index_map -> VMEM-resident
        return pl.BlockSpec(shape, lambda i: (0, 0))

    out = pl.pallas_call(
        _qmlp_kernel,
        out_shape=jax.ShapeDtypeStruct((1, b_pad), jnp.float32),
        grid=(b_pad // tb,),
        in_specs=[
            pl.BlockSpec((d_in, tb), lambda i: (0, i)),          # streamed batch tiles
            resident(w1T.shape),
            resident(b1T.shape),
            resident(w2T.shape),
            resident(b2T.shape),
            resident(w3c.shape),
            pl.BlockSpec(memory_space=pltpu.MemorySpace.SMEM),   # scalar b3
        ],
        out_specs=pl.BlockSpec((1, tb), lambda i: (0, i)),       # lane-dense output
        compiler_params=pltpu.CompilerParams(
            dimension_semantics=("parallel",)),
    )(xT, w1T, b1T, w2T, b2T, w3c, b3s)
    return out[0, :B]                            # drop pad columns; already 1-D


def init_params(key, obs_dim, act_dim, hidden_sizes):
    """Deterministic init mimicking torch.nn.Linear default (U[-1/sqrt(fan_in), +])."""
    sizes = [obs_dim + act_dim] + list(hidden_sizes) + [1]
    params = []
    for j in range(len(sizes) - 1):
        fan_in, fan_out = sizes[j], sizes[j + 1]
        key, kw, kb = jax.random.split(key, 3)
        bound = 1.0 / jnp.sqrt(jnp.float32(fan_in))
        # weight stored as (in, out) so the reference computes x @ W + b
        w = jax.random.uniform(kw, (fan_in, fan_out), jnp.float32, -bound, bound)
        b = jax.random.uniform(kb, (1, fan_out), jnp.float32, -bound, bound)
        params += [w, b]
    return tuple(params)


if __name__ == "__main__":
    obs_dim, act_dim = 16, 8
    hidden_sizes = (32, 32)
    batch = 8

    key = jax.random.PRNGKey(0)
    kobs, kact, kparam = jax.random.split(key, 3)
    obs = jax.random.normal(kobs, (batch, obs_dim), jnp.float32)
    act = jax.random.normal(kact, (batch, act_dim), jnp.float32)
    params = init_params(kparam, obs_dim, act_dim, hidden_sizes)

    q = mlp_q_function(obs, act, params)
    jax.block_until_ready(q)

    # Reference check in plain JAX (matches the PyTorch module semantics).
    w1, b1, w2, b2, w3, b3 = params
    x = jnp.concatenate([obs, act], axis=-1)
    h1 = jnp.maximum(x @ w1 + b1, 0.0)
    h2 = jnp.maximum(h1 @ w2 + b2, 0.0)
    q_ref = jnp.squeeze(h2 @ w3 + b3, -1)
    assert q.shape == (batch,)
    assert jnp.allclose(q, q_ref, atol=1e-4, rtol=1e-4)

    print("KERNEL_OK")
</pallas_src>

<mosaic_0001>
module attributes {stable_mosaic.version = 11 : i64} {
  func.func @_qmlp_kernel(%arg0: i32, %arg1: memref<24x128xf32, #tpu.memory_space<vmem>>, %arg2: memref<32x24xf32, #tpu.memory_space<vmem>>, %arg3: memref<32x1xf32, #tpu.memory_space<vmem>>, %arg4: memref<32x32xf32, #tpu.memory_space<vmem>>, %arg5: memref<32x1xf32, #tpu.memory_space<vmem>>, %arg6: memref<32x1xf32, #tpu.memory_space<vmem>>, %arg7: memref<1xf32, #tpu.memory_space<smem>>, %arg8: memref<1x128xf32, #tpu.memory_space<vmem>>) attributes {dimension_semantics = [#tpu.dimension_semantics<parallel>], iteration_bounds = array<i64: 1>, scalar_prefetch = 0 : i64, scratch_operands = 0 : i64, tpu.core_type = #tpu.core_type<tc>, window_params = [{transform_indices = @transform_0, window_bounds = array<i64: 24, 128>}, {pipeline_mode = #tpu.pipeline_mode<synchronous>, transform_indices = @transform_1, window_bounds = array<i64: 32, 24>}, {pipeline_mode = #tpu.pipeline_mode<synchronous>, transform_indices = @transform_2, window_bounds = array<i64: 32, 1>}, {pipeline_mode = #tpu.pipeline_mode<synchronous>, transform_indices = @transform_3, window_bounds = array<i64: 32, 32>}, {pipeline_mode = #tpu.pipeline_mode<synchronous>, transform_indices = @transform_4, window_bounds = array<i64: 32, 1>}, {pipeline_mode = #tpu.pipeline_mode<synchronous>, transform_indices = @transform_5, window_bounds = array<i64: 32, 1>}, {transform_indices = @transform_6, window_bounds = array<i64: 1>}, {transform_indices = @transform_7, window_bounds = array<i64: 1, 128>}]} {
    %c0 = arith.constant 0 : index
    %c0_0 = arith.constant 0 : index
    %0 = vector.load %arg1[%c0, %c0_0] : memref<24x128xf32, #tpu.memory_space<vmem>>, vector<24x128xf32>
    %c0_1 = arith.constant 0 : index
    %c0_2 = arith.constant 0 : index
    %1 = vector.load %arg2[%c0_1, %c0_2] : memref<32x24xf32, #tpu.memory_space<vmem>>, vector<32x24xf32>
    %cst = arith.constant dense<0.000000e+00> : vector<32x128xf32>
    %2 = tpu.matmul %1, %0, %cst {dimension_numbers = #tpu.dot_dimension_numbers<[1], [0], [0], [1], [0, 0, 1, 1], [], []>} : vector<32x24xf32>, vector<24x128xf32>, vector<32x128xf32> -> vector<32x128xf32>
    %c0_3 = arith.constant 0 : index
    %c0_4 = arith.constant 0 : index
    %3 = vector.load %arg3[%c0_3, %c0_4] : memref<32x1xf32, #tpu.memory_space<vmem>>, vector<32x1xf32>
    %4 = vector.broadcast %3 : vector<32x1xf32> to vector<32x128xf32>
    %5 = arith.addf %2, %4 : vector<32x128xf32>
    %cst_5 = arith.constant 0.000000e+00 : f32
    %6 = vector.broadcast %cst_5 : f32 to vector<32x128xf32>
    %7 = arith.maximumf %5, %6 : vector<32x128xf32>
    %c0_6 = arith.constant 0 : index
    %c0_7 = arith.constant 0 : index
    %8 = vector.load %arg4[%c0_6, %c0_7] : memref<32x32xf32, #tpu.memory_space<vmem>>, vector<32x32xf32>
    %cst_8 = arith.constant dense<0.000000e+00> : vector<32x128xf32>
    %9 = tpu.matmul %8, %7, %cst_8 {dimension_numbers = #tpu.dot_dimension_numbers<[1], [0], [0], [1], [0, 0, 1, 1], [], []>} : vector<32x32xf32>, vector<32x128xf32>, vector<32x128xf32> -> vector<32x128xf32>
    %c0_9 = arith.constant 0 : index
    %c0_10 = arith.constant 0 : index
    %10 = vector.load %arg5[%c0_9, %c0_10] : memref<32x1xf32, #tpu.memory_space<vmem>>, vector<32x1xf32>
    %11 = vector.broadcast %10 : vector<32x1xf32> to vector<32x128xf32>
    %12 = arith.addf %9, %11 : vector<32x128xf32>
    %cst_11 = arith.constant 0.000000e+00 : f32
    %13 = vector.broadcast %cst_11 : f32 to vector<32x128xf32>
    %14 = arith.maximumf %12, %13 : vector<32x128xf32>
    %c0_12 = arith.constant 0 : index
    %c0_13 = arith.constant 0 : index
    %15 = vector.load %arg6[%c0_12, %c0_13] : memref<32x1xf32, #tpu.memory_space<vmem>>, vector<32x1xf32>
    %16 = vector.broadcast %15 : vector<32x1xf32> to vector<32x128xf32>
    %17 = arith.mulf %14, %16 : vector<32x128xf32>
    %cst_14 = arith.constant dense<0.000000e+00> : vector<128xf32>
    %18 = vector.multi_reduction <add>, %17, %cst_14 [0] : vector<32x128xf32> to vector<128xf32>
    %19 = vector.shape_cast %18 : vector<128xf32> to vector<1x128xf32>
    %c0_15 = arith.constant 0 : index
    %20 = memref.load %arg7[%c0_15] : memref<1xf32, #tpu.memory_space<smem>>
    %21 = vector.broadcast %20 : f32 to vector<1x128xf32>
    %22 = arith.addf %19, %21 : vector<1x128xf32>
    %c0_16 = arith.constant 0 : index
    %c0_17 = arith.constant 0 : index
    %23 = vector.load %arg8[%c0_16, %c0_17] : memref<1x128xf32, #tpu.memory_space<vmem>>, vector<1x128xf32>
    tpu.vector_store %arg8[%c0_16, %c0_17], %22 {strides = array<i32>} : memref<1x128xf32, #tpu.memory_space<vmem>>, vector<1x128xf32>,
    return
  }
  func.func @transform_0(%arg0: i32) -> (i32, i32) {
    %c0_i32 = arith.constant 0 : i32
    %c0_i32_0 = arith.constant 0 : i32
    return %c0_i32, %arg0 : i32, i32
  }
  func.func @transform_1(%arg0: i32) -> (i32, i32) {
    %c0_i32 = arith.constant 0 : i32
    %c0_i32_0 = arith.constant 0 : i32
    %c0_i32_1 = arith.constant 0 : i32
    return %c0_i32, %c0_i32_0 : i32, i32
  }
  func.func @transform_2(%arg0: i32) -> (i32, i32) {
    %c0_i32 = arith.constant 0 : i32
    %c0_i32_0 = arith.constant 0 : i32
    %c0_i32_1 = arith.constant 0 : i32
    return %c0_i32, %c0_i32_0 : i32, i32
  }
  func.func @transform_3(%arg0: i32) -> (i32, i32) {
    %c0_i32 = arith.constant 0 : i32
    %c0_i32_0 = arith.constant 0 : i32
    %c0_i32_1 = arith.constant 0 : i32
    return %c0_i32, %c0_i32_0 : i32, i32
  }
  func.func @transform_4(%arg0: i32) -> (i32, i32) {
    %c0_i32 = arith.constant 0 : i32
    %c0_i32_0 = arith.constant 0 : i32
    %c0_i32_1 = arith.constant 0 : i32
    return %c0_i32, %c0_i32_0 : i32, i32
  }
  func.func @transform_5(%arg0: i32) -> (i32, i32) {
    %c0_i32 = arith.constant 0 : i32
    %c0_i32_0 = arith.constant 0 : i32
    %c0_i32_1 = arith.constant 0 : i32
    return %c0_i32, %c0_i32_0 : i32, i32
  }
  func.func @transform_6(%arg0: i32) -> i32 {
    %c0_i32 = arith.constant 0 : i32
    %c0_i32_0 = arith.constant 0 : i32
    return %c0_i32 : i32
  }
  func.func @transform_7(%arg0: i32) -> (i32, i32) {
    %c0_i32 = arith.constant 0 : i32
    %c0_i32_0 = arith.constant 0 : i32
    return %c0_i32, %arg0 : i32, i32
  }
}

</mosaic_0001>

<bundles_post_ra>
// kernel: tpu_custom_call.1
= control target key start
LH: loop header
LB: loop body
LE: loop exit
PB: predicated region body
PF: predicated region fallthrough
CT: control target
= control target key end

     0   :  { %v282_v2 = vmov 0   ;;  %vm59_vm0 = vcmask 195584   ;;  %s403_s0 = inlined_call_operand.vmem [shape: f32[24,128], index: 0, kind: input, shape index: {}]   ;;  %s404_s1 = inlined_call_operand.vmem [shape: f32[32,24], index: 1, kind: input, shape index: {}]   ;;  %s405_s2 = inlined_call_operand.vmem [shape: f32[32,1], index: 2, kind: input, shape index: {}]   ;;  %s406_s3 = inlined_call_operand.vmem [shape: f32[32,32], index: 3, kind: input, shape index: {}]   ;;  %s407_s4 = inlined_call_operand.vmem [shape: f32[32,1], index: 4, kind: input, shape index: {}]   ;;  %s408_s5 = inlined_call_operand.vmem [shape: f32[32,1], index: 5, kind: input, shape index: {}]   ;;  %s409_s6 = inlined_call_operand.<no memory space> [shape: f32[1], index: 6, kind: input, shape index: {}]   ;;  %s410_s7 = inlined_call_operand.hbm [shape: f32[1,128], index: 7, kind: output, shape index: {}]  }
   0x1   :  { %v30_v0 = vld [vmem:[%s403_s0 + $0x10] sm:$0xff]  ;;  %v29_v1 = vld [vmem:[%s403_s0 + $0x8] sm:$0xff]  ;;  %253 = vset.pattern.permute.xlu0 %v282_v2  ;;  %v38_v3 = vld [vmem:[%s405_s2 + $0x18] sm:$0xff]  ;;  %254 = vset.pattern.permute.xlu1 %v282_v2 }
   0x2   :  { %244 = vmatpush.msra.mxu3 %v30_v0  ;;  %v36_v4 = vld [vmem:[%s405_s2 + $0x8] sm:$0xff]  ;;  %v28_v5 = vld [vmem:[%s403_s0] sm:$0xff]  ;;  %56 = vperm.xlu0 %253, %v38_v3  }
   0x3   :  { %v32_v6 = vld [vmem:[%s404_s1 + $0x8] sm:$0xff]  ;;  %46 = vperm.xlu1 %254, %v36_v4   ;;  %85 = vmatpush.msra.mxu0 %v30_v0 }
   0x4   :  { %245 = vmatpush.msra.mxu3 %v29_v1  ;;  %255 = vset.pattern.permute.xlu2 %v282_v2 }
   0x6   :  { %246 = vmatpush.msra.mxu3 %v28_v5 }
   0x7   :  { %13 = vsyncpa [#allocation4], 0  ;;  %237 = vmatmul.msk.f32.vlgmr.msra.gmra.mxu3 %vm59_vm0, %v32_v6  ;;  %86 = vmatpush.msra.mxu0 %v29_v1  ;;  %v31_v7 = vld [vmem:[%s404_s1] sm:$0xff]  ;;  %v37_v8 = vld [vmem:[%s405_s2 + $0x10] sm:$0xff]  ;;  %vm133_vm1 = vcmask 261120   ;;  %s283_s19 = smov [#allocation3]  }
   0x8   :  { %v35_v9 = vld [vmem:[%s405_s2] sm:$0xff]  ;;  %v33_v10 = vld [vmem:[%s404_s1 + $0x10] sm:$0xff]  ;;  %v112_v12 = vld [vmem:[%s407_s4 + $0x18] sm:$0xff]  ;;  %s225_s20 = sshll.u32 %s283_s19, 4  ;;  %s227_s23 = sshll.u32 %s410_s7, 4  ;;  %s226_s20 = int_to_ptr.vmem [resolvable:$true] %s225_s20  ;;  %s228_s23 = int_to_ptr.hbm [resolvable:$true] %s227_s23 }
   0x9   :  { %87 = vmatpush.msra.mxu0 %v28_v5  ;;  %v111_v11 = vld [vmem:[%s407_s4 + $0x10] sm:$0xff]  ;;  %v34_v13 = vld [vmem:[%s404_s1 + $0x18] sm:$0xff]  ;;  %v180_v14 = vld [vmem:[%s408_s5 + $0x8] sm:$0xff] }
   0xa   :  { %236 = vmatmul.msk.f32.vlgmr.msra.gmra.mxu0 %vm59_vm0, %v31_v7  ;;  %51 = vperm.xlu0 %253, %v37_v8   ;;  %v181_v15 = vld [vmem:[%s408_s5 + $0x10] sm:$0xff]  ;;  %v109_v16 = vld [vmem:[%s407_s4] sm:$0xff]  ;;  %v110_v18 = vld [vmem:[%s407_s4 + $0x8] sm:$0xff]  ;;  %v217_v8 = vstv %s409_s6 }
   0xb   :  { %41 = vperm.xlu1 %254, %v35_v9   ;;  %115 = vperm.xlu2 %255, %v109_v16   ;;  %v179_v22 = vld [vmem:[%s408_s5] sm:$0xff]  ;;  %v182_v30 = vld [vmem:[%s408_s5 + $0x18] sm:$0xff]  ;;  %v107_v37 = vld [vmem:[%s406_s3 + $0x10] sm:$0xff] }
   0xc   :  { %v105_v36 = vld [vmem:[%s406_s3] sm:$0xff]  ;;  %v106_v38 = vld [vmem:[%s406_s3 + $0x8] sm:$0xff]  ;;  %v108_v39 = vld [vmem:[%s406_s3 + $0x18] sm:$0xff] }
   0xf   :  { %238 = vmatmul.msk.f32.gmra.mxu3 %vm59_vm0, %v33_v10 }
  0x12   :  { %125 = vperm.xlu0 %253, %v111_v11  }
  0x13   :  { %130 = vperm.xlu1 %254, %v112_v12   ;;  %120 = vperm.xlu2 %255, %v110_v18  }
  0x17   :  { %239 = vmatmul.msk.f32.gmra.mxu3 %vm59_vm0, %v34_v13 }
  0x1a   :  { %190 = vperm.xlu0 %253, %v180_v14  }
  0x1b   :  { %195 = vperm.xlu1 %254, %v181_v15   ;;  %185 = vperm.xlu2 %255, %v179_v22  }
  0x23   :  { %200 = vperm.xlu2 %255, %v182_v30  }
  0x65   :  { %v116_v40 = vpop.permute.xlu2 %115 }
  0x6d   :  { %v121_v41 = vpop.permute.xlu2 %120 }
  0x74   :  { %v57_v19 = vpop.permute.xlu0 %56 }
  0x75   :  { %v47_v21 = vpop.permute.xlu1 %46  ;;  %v186_v47 = vpop.permute.xlu2 %185 }
  0x7c   :  { %v52_v23 = vpop.permute.xlu0 %51 }
  0x7d   :  { %v42_v31 = vpop.permute.xlu1 %41  ;;  %v201_v63 = vpop.permute.xlu2 %200 }
  0x84   :  { %v126_v43 = vpop.permute.xlu0 %125 }
  0x85   :  { %v131_v45 = vpop.permute.xlu1 %130 }
  0x87   :  { %v89_v27 = vpop.f32.mrf.mxu0 }
  0x88   :  { %v90_v33 = vadd.f32 %v89_v27, %v42_v31 }
  0x8a   :  { %v92_v17 = vpop.f32.mrf.mxu3  ;;  %v101_v35 = vmax.f32 %v90_v33, 0.0 }
  0x8b   :  { %v93_v28 = vadd.f32 %v92_v17, %v47_v21 }
  0x8c   :  { %v191_v53 = vpop.permute.xlu0 %190 }
  0x8d   :  { %v102_v34 = vmax.f32 %v93_v28, 0.0  ;;  %v196_v60 = vpop.permute.xlu1 %195 }
  0x92   :  { %v95_v20 = vpop.f32.mrf.mxu3 }
  0x93   :  { %v96_v25 = vadd.f32 %v95_v20, %v52_v23 }
  0x95   :  { %v103_v32 = vmax.f32 %v96_v25, 0.0 }
  0x9a   :  { %v98_v24 = vpop.f32.mrf.mxu3 }
  0x9b   :  { %v99_v26 = vadd.f32 %v98_v24, %v57_v19 }
  0x9d   :  { %v104_v29 = vmax.f32 %v99_v26, 0.0 }
  0x9f   :  { %158 = vmatpush.msra.mxu1 %v104_v29  ;;  %247 = vmatpush.msra.mxu2 %v104_v29 }
  0xa1   :  { %159 = vmatpush.msra.mxu1 %v103_v32  ;;  %248 = vmatpush.msra.mxu2 %v103_v32 }
  0xa3   :  { %160 = vmatpush.msra.mxu1 %v102_v34  ;;  %249 = vmatpush.msra.mxu2 %v102_v34 }
  0xa5   :  { %161 = vmatpush.msra.mxu1 %v101_v35  ;;  %250 = vmatpush.msra.mxu2 %v101_v35 }
  0xa6   :  { %240 = vmatmul.msk.f32.vlgmr.msra.gmra.mxu1 %vm133_vm1, %v105_v36  ;;  %242 = vmatmul.msk.f32.vlgmr.msra.gmra.mxu2 %vm133_vm1, %v107_v37 }
  0xae   :  { %241 = vmatmul.msk.f32.gmra.mxu1 %vm133_vm1, %v106_v38  ;;  %243 = vmatmul.msk.f32.gmra.mxu2 %vm133_vm1, %v108_v39 }
 0x123   :  { %v163_v42 = vpop.f32.mrf.mxu1 }
 0x124   :  { %v164_v44 = vadd.f32 %v163_v42, %v116_v40 }
 0x126   :  { %v175_v49 = vmax.f32 %v164_v44, 0.0 }
 0x128   :  { %v203_v54 = vmul.f32 %v186_v47, %v175_v49 }
 0x129   :  { %v169_v46 = vpop.f32.mrf.mxu2 }
 0x12a   :  { %v170_v50 = vadd.f32 %v169_v46, %v126_v43 }
 0x12b   :  { %v166_v48 = vpop.f32.mrf.mxu1 }
 0x12c   :  { %v167_v51 = vadd.f32 %v166_v48, %v121_v41  ;;  %v177_v55 = vmax.f32 %v170_v50, 0.0 }
 0x12e   :  { %v176_v52 = vmax.f32 %v167_v51, 0.0  ;;  %v205_v61 = vmul.f32 %v196_v60, %v177_v55 }
 0x130   :  { %v204_v56 = vmul.f32 %v191_v53, %v176_v52 }
 0x131   :  { %v172_v57 = vpop.f32.mrf.mxu2 }
 0x132   :  { %v207_v58 = vadd.f32 %v204_v56, %v203_v54  ;;  %v173_v59 = vadd.f32 %v172_v57, %v131_v45 }
 0x134   :  { %v178_v62 = vmax.f32 %v173_v59, 0.0  ;;  %v208_v1 = vadd.f32 %v207_v58, %v205_v61 }
 0x136   :  { %v206_v0 = vmul.f32 %v201_v63, %v178_v62 }
 0x138   :  { %v209_v2 = vadd.f32 %v208_v1, %v206_v0 }
 0x13a   :  { %v210_v3 = vrot.slane %v209_v2, 4 }
 0x13c   :  { %v211_v4 = vadd.f32 %v210_v3, %v209_v2 }
 0x13e   :  { %v212_v5 = vrot.slane %v211_v4, 2 }
 0x140   :  { %v213_v6 = vadd.f32 %v212_v5, %v211_v4 }
 0x142   :  { %v214_v7 = vrot.slane %v213_v6, 1 }
 0x144   :  { %v215_v9 = vadd.f32 %v214_v7, %v213_v6 }
 0x146   :  { %v218_v10 = vadd.f32 %v217_v8, %v215_v9 }
 0x148   :  { %219 = vst [vmem:[#allocation3] sm:$0x1] %v218_v10 }
 0x149   :  { %230 = dma.vmem_to_hbm [thread:$0]  %s226_s20, 16, %s228_s23, [#allocation4]  }
 0x14a   :  { %280 = dma.done.wait [#allocation4], 16  }
 0x14b   :  { %281 = vsyncadd [#allocation4], 4294967280 }
 0x14c   :  { %235 = vsyncpa [#allocation4], 1 }

</bundles_post_ra>
